<compile_context>
chip_gen: v7x
topology: tpu7x:2x2x1
jax: 0.10.0
libtpu: 0.0.40
codegen_flags: <defaults>
</compile_context>

<pallas_src>
import functools

import jax
import jax.numpy as jnp
from jax.experimental import pallas as pl
from jax.experimental.pallas import tpu as pltpu


def _round_up(v, m):
    return ((v + m - 1) // m) * m


# --------------------------- fused forward kernel ----------------------------
def _fused_rnn_fc_kernel(x_ref, wx0_ref, wi_ref, wh_ref, b_ref, h0_ref,
                         fcw_ref, fcb_ref, out_ref, hT_ref, carry_ref,
                         *, nonlinearity):
    """One grid step == one RNN layer (seq_len == 1); FC head fused on last step.

    x_ref    : (B_pad, D_pad)      bf16, layer-0 input (resident across grid)
    wx0_ref  : (D_pad, H_pad)      bf16, layer-0 W_ih^T (resident)
    wi_ref   : (1, H_pad, H_pad)   bf16, layer-l W_ih^T (streamed; slot 0 unused)
    wh_ref   : (1, H_pad, H_pad)   bf16, layer-l W_hh^T (streamed)
    b_ref    : (1, 1, H_pad)       f32,  layer-l (b_ih + b_hh) (streamed)
    h0_ref   : (1, B_pad, H_pad)   f32,  layer-l initial hidden (streamed)
    fcw_ref  : (H_pad, O_pad)      bf16, W_fc^T (resident)
    fcb_ref  : (1, O_pad)          f32,  b_fc (resident)
    out_ref  : (B_pad, O_pad)      f32,  FC output (written on last layer only)
    hT_ref   : (1, B_pad, H_pad)   f32,  final hidden of layer l
    carry_ref: (B_pad, H_pad)      f32 scratch, persists across grid steps
    """
    layer = pl.program_id(0)
    n_layers = pl.num_programs(0)

    # Input-side matmul into the carry scratch: two accumulated dots replace the
    # old concatenate + single wide dot (no VMEM concat copy, no zero K rows).
    @pl.when(layer == 0)
    def _():
        carry_ref[...] = jnp.dot(x_ref[...], wx0_ref[...],
                                 preferred_element_type=jnp.float32)

    @pl.when(layer != 0)
    def _():
        h_below = carry_ref[...].astype(wi_ref.dtype)       # bf16 for the MXU
        carry_ref[...] = jnp.dot(h_below, wi_ref[0],
                                 preferred_element_type=jnp.float32)

    pre = (carry_ref[...]
           + jnp.dot(h0_ref[0].astype(wh_ref.dtype), wh_ref[0],
                     preferred_element_type=jnp.float32)
           + b_ref[0])                                      # f32 bias add (VPU)
    if nonlinearity == 'relu':
        h_new = jnp.maximum(pre, 0.0)                       # VPU
    else:  # 'tanh'
        h_new = jnp.tanh(pre)                               # EUP slot
    hT_ref[0] = h_new
    carry_ref[...] = h_new                                  # feeds the next layer

    @pl.when(layer == n_layers - 1)
    def _():
        out_ref[...] = (jnp.dot(h_new.astype(fcw_ref.dtype), fcw_ref[...],
                                preferred_element_type=jnp.float32)
                        + fcb_ref[...])


# --------------------------- jitted forward wrapper ---------------------------
def _simple_rnn_forward(x, hidden, wx0, wi_stack, wh_stack, b_stack, fc_wT,
                        fc_bp, *, n_layers, active_fun, input_size, hidden_dim,
                        output_size, d_pad, h_pad, o_pad):
    batch = x.shape[0]
    b_pad = _round_up(max(batch, 8), 8)

    # Lane/sublane-dense zero padding. Padded columns provably stay zero through
    # every layer: padded weight/bias columns are zero and relu(0)=tanh(0)=0.
    x_pad = (jnp.zeros((b_pad, d_pad), jnp.bfloat16)
             .at[:batch, :input_size].set(x[:, 0, :].astype(jnp.bfloat16)))
    h0_pad = (jnp.zeros((n_layers, b_pad, h_pad), jnp.float32)
              .at[:, :batch, :hidden_dim].set(hidden.astype(jnp.float32)))

    kernel = functools.partial(_fused_rnn_fc_kernel, nonlinearity=active_fun)

    flops = (2 * b_pad * d_pad * h_pad                         # layer-0 x @ W_ih
             + 2 * b_pad * h_pad * h_pad * (2 * n_layers - 1)  # W_ih (L-1) + W_hh (L)
             + 2 * b_pad * h_pad * o_pad)                      # FC head
    transcendentals = n_layers * b_pad * h_pad if active_fun == 'tanh' else 0
    bytes_accessed = (
        2 * (wx0.size + wi_stack.size + wh_stack.size + fc_wT.size + x_pad.size)
        + 4 * (b_stack.size + fc_bp.size + 2 * h0_pad.size + b_pad * o_pad))

    out_pad, hT_pad = pl.pallas_call(
        kernel,
        out_shape=(jax.ShapeDtypeStruct((b_pad, o_pad), jnp.float32),
                   jax.ShapeDtypeStruct((n_layers, b_pad, h_pad), jnp.float32)),
        grid_spec=pltpu.PrefetchScalarGridSpec(
            num_scalar_prefetch=0,
            grid=(n_layers,),
            in_specs=[
                pl.BlockSpec((b_pad, d_pad), lambda l: (0, 0)),        # x
                pl.BlockSpec((d_pad, h_pad), lambda l: (0, 0)),        # W_ih0^T
                pl.BlockSpec((1, h_pad, h_pad), lambda l: (l, 0, 0)),  # W_ih^T (l>0)
                pl.BlockSpec((1, h_pad, h_pad), lambda l: (l, 0, 0)),  # W_hh^T
                pl.BlockSpec((1, 1, h_pad), lambda l: (l, 0, 0)),      # bias
                pl.BlockSpec((1, b_pad, h_pad), lambda l: (l, 0, 0)),  # h0
                pl.BlockSpec((h_pad, o_pad), lambda l: (0, 0)),        # W_fc^T
                pl.BlockSpec((1, o_pad), lambda l: (0, 0)),            # b_fc
            ],
            out_specs=(
                pl.BlockSpec((b_pad, o_pad), lambda l: (0, 0)),        # FC out
                pl.BlockSpec((1, b_pad, h_pad), lambda l: (l, 0, 0)),  # hT
            ),
            scratch_shapes=[pltpu.VMEM((b_pad, h_pad), jnp.float32)],
        ),
        compiler_params=pltpu.CompilerParams(
            dimension_semantics=("arbitrary",),     # layers carry a dependency
            vmem_limit_bytes=48 * 1024 * 1024),     # explicit: safe on v5e/v6e/v7x
        cost_estimate=pl.CostEstimate(flops=flops,
                                      transcendentals=transcendentals,
                                      bytes_accessed=bytes_accessed),
        input_output_aliases={5: 1},                # h0_pad -> hT (in-place update)
    )(x_pad, wx0, wi_stack, wh_stack, b_stack, h0_pad, fc_wT, fc_bp)

    output = out_pad[:batch, :output_size]
    new_hidden = hT_pad[:, :batch, :hidden_dim]
    return output, new_hidden


# --------------------------------- SimpleRNN ----------------------------------
class SimpleRNN:
    """JAX/Pallas port of the PyTorch SimpleRNN module (forward only)."""

    def __init__(self, input_size, output_size, hidden_dim, n_layers,
                 active_fun='relu', key=None):
        assert active_fun in ('relu', 'tanh')
        self.input_size = input_size
        self.output_size = output_size
        self.hidden_dim = hidden_dim
        self.n_layers = n_layers
        self.active_fun = active_fun

        if key is None:
            key = jax.random.PRNGKey(0)
        # PyTorch init: U(-1/sqrt(hidden_dim), 1/sqrt(hidden_dim)) — synthetic
        # deterministic weights (no checkpoint load).
        bound = 1.0 / (hidden_dim ** 0.5)
        self.rnn_params = []
        for layer in range(n_layers):
            d_in = input_size if layer == 0 else hidden_dim
            key, k1, k2, k3, k4 = jax.random.split(key, 5)
            self.rnn_params.append(dict(
                w_ih=jax.random.uniform(k1, (hidden_dim, d_in), jnp.float32,
                                        -bound, bound),
                w_hh=jax.random.uniform(k2, (hidden_dim, hidden_dim),
                                        jnp.float32, -bound, bound),
                b_ih=jax.random.uniform(k3, (hidden_dim,), jnp.float32,
                                        -bound, bound),
                b_hh=jax.random.uniform(k4, (hidden_dim,), jnp.float32,
                                        -bound, bound),
            ))
        key, k1, k2 = jax.random.split(key, 3)
        self.fc_w = jax.random.uniform(k1, (output_size, hidden_dim),
                                       jnp.float32, -bound, bound)
        self.fc_b = jax.random.uniform(k2, (output_size,), jnp.float32,
                                       -bound, bound)

        # ---- one-time packing: lane-dense (multiple-of-128), transposed,
        # ---- stacked across layers, biases pre-summed, weights in bf16.
        self.H_pad = _round_up(hidden_dim, 128)
        self.D_pad = _round_up(input_size, 128)
        self.O_pad = _round_up(output_size, 128)

        wx0 = (jnp.zeros((self.D_pad, self.H_pad), jnp.float32)
               .at[:input_size, :hidden_dim].set(self.rnn_params[0]['w_ih'].T))
        wi = jnp.zeros((n_layers, self.H_pad, self.H_pad), jnp.float32)
        wh = jnp.zeros((n_layers, self.H_pad, self.H_pad), jnp.float32)
        bb = jnp.zeros((n_layers, 1, self.H_pad), jnp.float32)
        for l, p in enumerate(self.rnn_params):
            if l > 0:
                wi = wi.at[l, :hidden_dim, :hidden_dim].set(p['w_ih'].T)
            wh = wh.at[l, :hidden_dim, :hidden_dim].set(p['w_hh'].T)
            bb = bb.at[l, 0, :hidden_dim].set(p['b_ih'] + p['b_hh'])
        self.wx0 = wx0.astype(jnp.bfloat16)
        self.wi_stack = wi.astype(jnp.bfloat16)
        self.wh_stack = wh.astype(jnp.bfloat16)
        self.b_stack = bb                                        # biases stay f32
        self.fc_wT = (jnp.zeros((self.H_pad, self.O_pad), jnp.float32)
                      .at[:hidden_dim, :output_size].set(self.fc_w.T)
                      ).astype(jnp.bfloat16)
        self.fc_bp = (jnp.zeros((1, self.O_pad), jnp.float32)
                      .at[0, :output_size].set(self.fc_b))

        # One jitted executable: pad ops + pallas_call + un-pad slicing fused.
        self._jit_forward = jax.jit(functools.partial(
            _simple_rnn_forward, n_layers=n_layers, active_fun=active_fun,
            input_size=input_size, hidden_dim=hidden_dim,
            output_size=output_size, d_pad=self.D_pad, h_pad=self.H_pad,
            o_pad=self.O_pad))

    def forward(self, x, hidden):
        """x: (B, S, input_size) batch_first; hidden: (n_layers, B, hidden_dim)."""
        batch_size, seq_len, d = x.shape
        assert d == self.input_size
        # fc = Linear(hidden_dim, output_size) applied to r_out.view(B, -1)
        # is only shape-consistent when seq_len * hidden_dim == hidden_dim.
        assert seq_len == 1, (
            "fc(in_features=hidden_dim) requires seq_len == 1, as in the "
            "reference PyTorch forward")
        return self._jit_forward(x, hidden, self.wx0, self.wi_stack,
                                 self.wh_stack, self.b_stack, self.fc_wT,
                                 self.fc_bp)

    __call__ = forward


# ------------------------- pure-JAX reference (check) -------------------------
def _reference_forward(model, x, hidden):
    """Mirrors the kernel's numerics: bf16 weights/activations into the dots,
    f32 accumulation, f32 bias + nonlinearity."""
    B, S, _ = x.shape
    inp = x.astype(jnp.float32)
    hs = []
    for l in range(model.n_layers):
        p = model.rnn_params[l]
        w_ih = p['w_ih'].T.astype(jnp.bfloat16)
        w_hh = p['w_hh'].T.astype(jnp.bfloat16)
        h = hidden[l].astype(jnp.float32)
        outs = []
        for t in range(S):
            pre = (jnp.dot(inp[:, t].astype(jnp.bfloat16), w_ih,
                           preferred_element_type=jnp.float32)
                   + jnp.dot(h.astype(jnp.bfloat16), w_hh,
                             preferred_element_type=jnp.float32)
                   + p['b_ih'] + p['b_hh'])
            h = jnp.maximum(pre, 0.0) if model.active_fun == 'relu' else jnp.tanh(pre)
            outs.append(h)
        inp = jnp.stack(outs, axis=1)
        hs.append(h)
    r_flat = inp.reshape(B, -1)
    out = (jnp.dot(r_flat.astype(jnp.bfloat16),
                   model.fc_w.T.astype(jnp.bfloat16),
                   preferred_element_type=jnp.float32) + model.fc_b)
    return out, jnp.stack(hs, axis=0)


# ------------------------------------ main -------------------------------------
if __name__ == "__main__":
    batch = 2
    seq_len = 1            # forced by fc(r_out.view(B, -1)) in the reference
    input_size = 16
    hidden_dim = 32
    n_layers = 2
    output_size = 8

    key = jax.random.PRNGKey(0)
    kx, kh, kp = jax.random.split(key, 3)
    x = jax.random.normal(kx, (batch, seq_len, input_size), dtype=jnp.float32)
    h0 = jax.random.normal(kh, (n_layers, batch, hidden_dim), dtype=jnp.float32)

    model = SimpleRNN(input_size, output_size, hidden_dim, n_layers,
                      active_fun='relu', key=kp)
    out, hidden = model(x, h0)
    jax.block_until_ready((out, hidden))

    assert out.shape == (batch, output_size)
    assert hidden.shape == (n_layers, batch, hidden_dim)

    # Tolerance reflects bf16 weights (both paths use identical bf16 rounding).
    ref_out, ref_hidden = _reference_forward(model, x, h0)
    assert jnp.allclose(out, ref_out, atol=1e-3, rtol=1e-3)
    assert jnp.allclose(hidden, ref_hidden, atol=1e-3, rtol=1e-3)

    print("KERNEL_OK")
</pallas_src>

<mosaic_0001>
module attributes {stable_mosaic.version = 11 : i64} {
  func.func @_fused_rnn_fc_kernel(%arg0: i32, %arg1: memref<8x128xbf16, #tpu.memory_space<vmem>>, %arg2: memref<128x128xbf16, #tpu.memory_space<vmem>>, %arg3: memref<1x128x128xbf16, #tpu.memory_space<vmem>>, %arg4: memref<1x128x128xbf16, #tpu.memory_space<vmem>>, %arg5: memref<1x1x128xf32, #tpu.memory_space<vmem>>, %arg6: memref<1x8x128xf32, #tpu.memory_space<vmem>>, %arg7: memref<128x128xbf16, #tpu.memory_space<vmem>>, %arg8: memref<1x128xf32, #tpu.memory_space<vmem>>, %arg9: memref<8x128xf32, #tpu.memory_space<vmem>>, %arg10: memref<1x8x128xf32, #tpu.memory_space<vmem>>, %arg11: memref<8x128xf32, #tpu.memory_space<vmem>>) attributes {dimension_semantics = [#tpu.dimension_semantics<arbitrary>], iteration_bounds = array<i64: 2>, scalar_prefetch = 0 : i64, scratch_operands = 1 : i64, tpu.core_type = #tpu.core_type<tc>, window_params = [{pipeline_mode = #tpu.pipeline_mode<synchronous>, transform_indices = @transform_0, window_bounds = array<i64: 8, 128>}, {pipeline_mode = #tpu.pipeline_mode<synchronous>, transform_indices = @transform_1, window_bounds = array<i64: 128, 128>}, {transform_indices = @transform_2, window_bounds = array<i64: 1, 128, 128>}, {transform_indices = @transform_3, window_bounds = array<i64: 1, 128, 128>}, {transform_indices = @transform_4, window_bounds = array<i64: 1, 1, 128>}, {transform_indices = @transform_5, window_bounds = array<i64: 1, 8, 128>}, {pipeline_mode = #tpu.pipeline_mode<synchronous>, transform_indices = @transform_6, window_bounds = array<i64: 128, 128>}, {pipeline_mode = #tpu.pipeline_mode<synchronous>, transform_indices = @transform_7, window_bounds = array<i64: 1, 128>}, {pipeline_mode = #tpu.pipeline_mode<synchronous>, transform_indices = @transform_8, window_bounds = array<i64: 8, 128>}, {transform_indices = @transform_9, window_bounds = array<i64: 1, 8, 128>}]} {
    %c0_i32 = arith.constant 0 : i32
    %0 = arith.cmpi eq, %arg0, %c0_i32 : i32
    %1 = arith.extui %0 : i1 to i32
    %c0_i32_0 = arith.constant 0 : i32
    %2 = arith.cmpi ne, %1, %c0_i32_0 : i32
    scf.if %2 {
      %c0_20 = arith.constant 0 : index
      %c0_21 = arith.constant 0 : index
      %27 = vector.load %arg1[%c0_20, %c0_21] : memref<8x128xbf16, #tpu.memory_space<vmem>>, vector<8x128xbf16>
      %c0_22 = arith.constant 0 : index
      %c0_23 = arith.constant 0 : index
      %28 = vector.load %arg2[%c0_22, %c0_23] : memref<128x128xbf16, #tpu.memory_space<vmem>>, vector<128x128xbf16>
      %cst_24 = arith.constant dense<0.000000e+00> : vector<8x128xf32>
      %29 = tpu.matmul %27, %28, %cst_24 {dimension_numbers = #tpu.dot_dimension_numbers<[1], [0], [0], [1], [0, 0, 1, 1], [], []>} : vector<8x128xbf16>, vector<128x128xbf16>, vector<8x128xf32> -> vector<8x128xf32>
      %c0_25 = arith.constant 0 : index
      %c0_26 = arith.constant 0 : index
      %30 = vector.load %arg11[%c0_25, %c0_26] : memref<8x128xf32, #tpu.memory_space<vmem>>, vector<8x128xf32>
      tpu.vector_store %arg11[%c0_25, %c0_26], %29 {strides = array<i32>} : memref<8x128xf32, #tpu.memory_space<vmem>>, vector<8x128xf32>,
    } else {
    }
    %c0_i32_1 = arith.constant 0 : i32
    %3 = arith.cmpi ne, %arg0, %c0_i32_1 : i32
    %4 = arith.extui %3 : i1 to i32
    %c0_i32_2 = arith.constant 0 : i32
    %5 = arith.cmpi ne, %4, %c0_i32_2 : i32
    scf.if %5 {
      %c0_20 = arith.constant 0 : index
      %c0_21 = arith.constant 0 : index
      %27 = vector.load %arg11[%c0_20, %c0_21] : memref<8x128xf32, #tpu.memory_space<vmem>>, vector<8x128xf32>
      %28 = arith.truncf %27 : vector<8x128xf32> to vector<8x128xbf16>
      %c0_22 = arith.constant 0 : index
      %c0_23 = arith.constant 0 : index
      %c0_24 = arith.constant 0 : index
      %29 = vector.load %arg3[%c0_22, %c0_23, %c0_24] : memref<1x128x128xbf16, #tpu.memory_space<vmem>>, vector<1x128x128xbf16>
      %30 = vector.shape_cast %29 : vector<1x128x128xbf16> to vector<128x128xbf16>
      %cst_25 = arith.constant dense<0.000000e+00> : vector<8x128xf32>
      %31 = tpu.matmul %28, %30, %cst_25 {dimension_numbers = #tpu.dot_dimension_numbers<[1], [0], [0], [1], [0, 0, 1, 1], [], []>} : vector<8x128xbf16>, vector<128x128xbf16>, vector<8x128xf32> -> vector<8x128xf32>
      %c0_26 = arith.constant 0 : index
      %c0_27 = arith.constant 0 : index
      %32 = vector.load %arg11[%c0_26, %c0_27] : memref<8x128xf32, #tpu.memory_space<vmem>>, vector<8x128xf32>
      tpu.vector_store %arg11[%c0_26, %c0_27], %31 {strides = array<i32>} : memref<8x128xf32, #tpu.memory_space<vmem>>, vector<8x128xf32>,
    } else {
    }
    %c0 = arith.constant 0 : index
    %c0_3 = arith.constant 0 : index
    %6 = vector.load %arg11[%c0, %c0_3] : memref<8x128xf32, #tpu.memory_space<vmem>>, vector<8x128xf32>
    %c0_4 = arith.constant 0 : index
    %c0_5 = arith.constant 0 : index
    %c0_6 = arith.constant 0 : index
    %7 = vector.load %arg6[%c0_4, %c0_5, %c0_6] : memref<1x8x128xf32, #tpu.memory_space<vmem>>, vector<1x8x128xf32>
    %8 = vector.shape_cast %7 : vector<1x8x128xf32> to vector<8x128xf32>
    %9 = arith.truncf %8 : vector<8x128xf32> to vector<8x128xbf16>
    %c0_7 = arith.constant 0 : index
    %c0_8 = arith.constant 0 : index
    %c0_9 = arith.constant 0 : index
    %10 = vector.load %arg4[%c0_7, %c0_8, %c0_9] : memref<1x128x128xbf16, #tpu.memory_space<vmem>>, vector<1x128x128xbf16>
    %11 = vector.shape_cast %10 : vector<1x128x128xbf16> to vector<128x128xbf16>
    %cst = arith.constant dense<0.000000e+00> : vector<8x128xf32>
    %12 = tpu.matmul %9, %11, %cst {dimension_numbers = #tpu.dot_dimension_numbers<[1], [0], [0], [1], [0, 0, 1, 1], [], []>} : vector<8x128xbf16>, vector<128x128xbf16>, vector<8x128xf32> -> vector<8x128xf32>
    %13 = arith.addf %6, %12 : vector<8x128xf32>
    %c0_10 = arith.constant 0 : index
    %c0_11 = arith.constant 0 : index
    %c0_12 = arith.constant 0 : index
    %14 = vector.load %arg5[%c0_10, %c0_11, %c0_12] : memref<1x1x128xf32, #tpu.memory_space<vmem>>, vector<1x1x128xf32>
    %15 = vector.shape_cast %14 : vector<1x1x128xf32> to vector<1x128xf32>
    %16 = vector.broadcast %15 : vector<1x128xf32> to vector<8x128xf32>
    %17 = arith.addf %13, %16 : vector<8x128xf32>
    %cst_13 = arith.constant 0.000000e+00 : f32
    %18 = vector.broadcast %cst_13 : f32 to vector<8x128xf32>
    %19 = arith.maximumf %17, %18 : vector<8x128xf32>
    %c0_14 = arith.constant 0 : index
    %c0_15 = arith.constant 0 : index
    %c0_16 = arith.constant 0 : index
    %20 = vector.load %arg10[%c0_14, %c0_15, %c0_16] : memref<1x8x128xf32, #tpu.memory_space<vmem>>, vector<1x8x128xf32>
    %21 = vector.shape_cast %20 : vector<1x8x128xf32> to vector<8x128xf32>
    %22 = vector.shape_cast %19 : vector<8x128xf32> to vector<1x8x128xf32>
    tpu.vector_store %arg10[%c0_14, %c0_15, %c0_16], %22 {strides = array<i32>} : memref<1x8x128xf32, #tpu.memory_space<vmem>>, vector<1x8x128xf32>,
    %c0_17 = arith.constant 0 : index
    %c0_18 = arith.constant 0 : index
    %23 = vector.load %arg11[%c0_17, %c0_18] : memref<8x128xf32, #tpu.memory_space<vmem>>, vector<8x128xf32>
    tpu.vector_store %arg11[%c0_17, %c0_18], %19 {strides = array<i32>} : memref<8x128xf32, #tpu.memory_space<vmem>>, vector<8x128xf32>,
    %c1_i32 = arith.constant 1 : i32
    %24 = arith.cmpi eq, %arg0, %c1_i32 : i32
    %25 = arith.extui %24 : i1 to i32
    %c0_i32_19 = arith.constant 0 : i32
    %26 = arith.cmpi ne, %25, %c0_i32_19 : i32
    scf.if %26 {
      %27 = arith.truncf %19 : vector<8x128xf32> to vector<8x128xbf16>
      %c0_20 = arith.constant 0 : index
      %c0_21 = arith.constant 0 : index
      %28 = vector.load %arg7[%c0_20, %c0_21] : memref<128x128xbf16, #tpu.memory_space<vmem>>, vector<128x128xbf16>
      %cst_22 = arith.constant dense<0.000000e+00> : vector<8x128xf32>
      %29 = tpu.matmul %27, %28, %cst_22 {dimension_numbers = #tpu.dot_dimension_numbers<[1], [0], [0], [1], [0, 0, 1, 1], [], []>} : vector<8x128xbf16>, vector<128x128xbf16>, vector<8x128xf32> -> vector<8x128xf32>
      %c0_23 = arith.constant 0 : index
      %c0_24 = arith.constant 0 : index
      %30 = vector.load %arg8[%c0_23, %c0_24] : memref<1x128xf32, #tpu.memory_space<vmem>>, vector<1x128xf32>
      %31 = vector.broadcast %30 : vector<1x128xf32> to vector<8x128xf32>
      %32 = arith.addf %29, %31 : vector<8x128xf32>
      %c0_25 = arith.constant 0 : index
      %c0_26 = arith.constant 0 : index
      %33 = vector.load %arg9[%c0_25, %c0_26] : memref<8x128xf32, #tpu.memory_space<vmem>>, vector<8x128xf32>
      tpu.vector_store %arg9[%c0_25, %c0_26], %32 {strides = array<i32>} : memref<8x128xf32, #tpu.memory_space<vmem>>, vector<8x128xf32>,
    } else {
    }
    return
  }
  func.func @transform_0(%arg0: i32) -> (i32, i32) {
    %c0_i32 = arith.constant 0 : i32
    %c0_i32_0 = arith.constant 0 : i32
    %c0_i32_1 = arith.constant 0 : i32
    return %c0_i32, %c0_i32_0 : i32, i32
  }
  func.func @transform_1(%arg0: i32) -> (i32, i32) {
    %c0_i32 = arith.constant 0 : i32
    %c0_i32_0 = arith.constant 0 : i32
    %c0_i32_1 = arith.constant 0 : i32
    return %c0_i32, %c0_i32_0 : i32, i32
  }
  func.func @transform_2(%arg0: i32) -> (i32, i32, i32) {
    %c0_i32 = arith.constant 0 : i32
    %c0_i32_0 = arith.constant 0 : i32
    %c0_i32_1 = arith.constant 0 : i32
    return %arg0, %c0_i32, %c0_i32_0 : i32, i32, i32
  }
  func.func @transform_3(%arg0: i32) -> (i32, i32, i32) {
    %c0_i32 = arith.constant 0 : i32
    %c0_i32_0 = arith.constant 0 : i32
    %c0_i32_1 = arith.constant 0 : i32
    return %arg0, %c0_i32, %c0_i32_0 : i32, i32, i32
  }
  func.func @transform_4(%arg0: i32) -> (i32, i32, i32) {
    %c0_i32 = arith.constant 0 : i32
    %c0_i32_0 = arith.constant 0 : i32
    %c0_i32_1 = arith.constant 0 : i32
    return %arg0, %c0_i32, %c0_i32_0 : i32, i32, i32
  }
  func.func @transform_5(%arg0: i32) -> (i32, i32, i32) {
    %c0_i32 = arith.constant 0 : i32
    %c0_i32_0 = arith.constant 0 : i32
    %c0_i32_1 = arith.constant 0 : i32
    return %arg0, %c0_i32, %c0_i32_0 : i32, i32, i32
  }
  func.func @transform_6(%arg0: i32) -> (i32, i32) {
    %c0_i32 = arith.constant 0 : i32
    %c0_i32_0 = arith.constant 0 : i32
    %c0_i32_1 = arith.constant 0 : i32
    return %c0_i32, %c0_i32_0 : i32, i32
  }
  func.func @transform_7(%arg0: i32) -> (i32, i32) {
    %c0_i32 = arith.constant 0 : i32
    %c0_i32_0 = arith.constant 0 : i32
    %c0_i32_1 = arith.constant 0 : i32
    return %c0_i32, %c0_i32_0 : i32, i32
  }
  func.func @transform_8(%arg0: i32) -> (i32, i32) {
    %c0_i32 = arith.constant 0 : i32
    %c0_i32_0 = arith.constant 0 : i32
    %c0_i32_1 = arith.constant 0 : i32
    return %c0_i32, %c0_i32_0 : i32, i32
  }
  func.func @transform_9(%arg0: i32) -> (i32, i32, i32) {
    %c0_i32 = arith.constant 0 : i32
    %c0_i32_0 = arith.constant 0 : i32
    %c0_i32_1 = arith.constant 0 : i32
    return %arg0, %c0_i32, %c0_i32_0 : i32, i32, i32
  }
}

</mosaic_0001>

<bundles_post_ra>
// kernel: _simple_rnn_forward.1
= control target key start
LH: loop header
LB: loop body
LE: loop exit
PB: predicated region body
PF: predicated region fallthrough
CT: control target
= control target key end

     0   :  { %s1843_s0 = inlined_call_operand.vmem [shape: bf16[8,128], index: 0, kind: input, shape index: {}]   ;;  %s1844_s1 = inlined_call_operand.hbm [shape: bf16[128,128], index: 1, kind: input, shape index: {}]   ;;  %s1845_s2 = inlined_call_operand.hbm [shape: bf16[2,128,128], index: 2, kind: input, shape index: {}]   ;;  %s1846_s3 = inlined_call_operand.hbm [shape: bf16[2,128,128], index: 3, kind: input, shape index: {}]   ;;  %s1847_s4 = inlined_call_operand.vmem [shape: f32[2,1,128], index: 4, kind: input, shape index: {}]   ;;  %s1848_s5 = inlined_call_operand.vmem [shape: f32[2,8,128], index: 5, kind: input, shape index: {}, may-alias: {5,9}]   ;;  %s1849_s6 = inlined_call_operand.hbm [shape: bf16[128,128], index: 6, kind: input, shape index: {}]   ;;  %s1850_s7 = inlined_call_operand.vmem [shape: f32[1,128], index: 7, kind: input, shape index: {}]   ;;  %s1851_s8 = inlined_call_operand.vmem [shape: f32[8,128], index: 8, kind: output, shape index: {0}]   ;;  %s1852_s9 = inlined_call_operand.vmem [shape: f32[2,8,128], index: 9, kind: output, shape index: {1}, may-alias: {5,9}]  }
   0x1   :  { %1860 = sst [smem:[#allocation13_spill]] %s1845_s2 }
   0x2   :  { %15 = vsyncpa [#allocation4], 0 }
   0x3   :  { %16 = vsyncpa [#allocation6], 0 }
   0x4   :  { %18 = vsyncpa [#allocation6 + $0x1], 0 }
   0x5   :  { %19 = vsyncpa [#allocation9], 0  ;;  %s1545_s30 = smov 0   ;;  %s1547_s10 = smov 0  }
   0x6   :  { %s1549_s11 = smov 0   ;;  %s1551_s12 = smov 0  }
   0x7 LB: > { %s1566_s13 = sadd.s32 1, %s1479_s12   ;;  %s74_s14 = sadd.s32 1, %s1475_s11  ;;  %s1479_s12 = sphi %s1551_s12, %s1879_s12   ;;  %s1475_s11 = sphi %s1549_s11, %s1878_s11   ;;  %s1471_s10 = sphi %s1547_s10, %s1877_s10   ;;  %s1467_s30 = sphi %s1545_s30, %s1876_s30  }
   0x8   : > { %s71_s15 = ssub.s32 %s1479_s12, %s1566_s13  ;;  %p81_p0 = scmp.ne.s32.totalorder %s1475_s11, %s1471_s10 }
   0x9   : > { %p72_p1 = scmp.eq.s32.totalorder %s71_s15, 0  ;;  %p82_p2 = scmp.eq.s32.totalorder %s1479_s12, 0 }
   0xa   : > { %p1242_p4 = scmp.lt.s32.totalorder %s1479_s12, 2  ;;  %s310_s17 = sand.u32 1, %s1479_s12  }
   0xb   : > { %s1575_s16 = scalar_select %p72_p1, %s1475_s11, %s74_s14  }
   0xc   : > { %p83_p3 = por %p82_p2, %p81_p0  ;;  %s312_s18 = sand.u32 1, %s1475_s11  }
   0xd   : > { %s1580_s19 = sshll.u32 %s312_s18, 6  ;;  %s1096_s20 = sshll.u32 %s1479_s12, 10 }
   0xe   : > { %s1861_s2 = sld [smem:[#allocation13_spill]]  ;;  %s314_s24 = scalar_lea.vmem [#allocation5], %s1580_s19 }
   0xf   : > { %s321_s25 = sshll.u32 %s314_s24, 4  ;;  %p1591_p5 = pnand %p1242_p4, %p83_p3  ;;  %s1595_s25 = int_to_ptr.vmem [resolvable:$true] %s321_s25 }
  0x10   : > { %s1597_s27 = scalar_lea.sflag [#allocation6], %s310_s17 }
  0x11   : > { %p1323_p7 = pneg %p1591_p5 }
  0x14   : > { %s1588_s23 = scalar_lea.hbm %s1861_s2, %s1096_s20  ;;  %s1326_s15 = scalar_lea.hbm %s1861_s2, 2048 }
  0x15   : > { %s1321_s28 = scalar_lea.hbm %s1588_s23, 1024  ;;  %p1327_p10 = scmp.lt.u32.totalorder %s1588_s23, %s1861_s2 }
  0x16   : > { %p1322_p6 = scmp.ne.s32.totalorder %s1588_s23, %s1321_s28  ;;  %p1328_p11 = scmp.lt.u32.totalorder %s1326_s15, %s1321_s28 }
  0x17   : > { %p1330_p13 = scmp.lt.u32.totalorder %s1321_s28, %s1588_s23 }
  0x18   : > { %p1324_p8 = pnand %p1323_p7, %p1322_p6  ;;  %p1329_p12 = por %p1328_p11, %p1327_p10 }
  0x1a   : > { %p1325_p9 = pneg %p1324_p8  ;;  %p1331_p0 = por %p1330_p13, %p1329_p12 }
  0x1c   : > { %p1332_p1 = pnand %p1331_p0, %p1325_p9 }
  0x1e   : > { %1335 = shalt.err (!%p1332_p1)
}
  0x1f   : > { %s1336_s17 = scalar_lea.vmem %s1595_s25, 1024  ;;  %s1481_s22 = smov [#allocation5]  }
  0x20   : > { %p1337_p2 = scmp.ne.s32.totalorder %s1595_s25, %s1336_s17  ;;  %s1341_s24 = sshll.u32 %s1481_s22, 4  ;;  %s1342_s24 = int_to_ptr.vmem [resolvable:$false] %s1341_s24 }
  0x21   : > { %s1343_s29 = scalar_lea.vmem %s1342_s24, 2048  ;;  %p1344_p6 = scmp.lt.s32.totalorder %s1595_s25, %s1342_s24 }
  0x22   : > { %p1339_p3 = pnand %p1337_p2, %p1323_p7  ;;  %p1345_p8 = scmp.lt.s32.totalorder %s1343_s29, %s1336_s17 }
  0x24   : > { %p1340_p4 = pneg %p1339_p3  ;;  %p1346_p10 = por %p1345_p8, %p1344_p6 }
  0x26   : > { %p1347_p11 = pnand %p1346_p10, %p1340_p4 }
  0x28   : > { %1350 = shalt.err (!%p1347_p11)
}
  0x29   : > { %s1853_s28 = smov 64   ;;  %s1856_s14 = smov 4  }
  0x2a   : > { %1236 = dma.hbm_to_vmem [thread:$0]  (!%p1591_p5), %s1588_s23, 1024, %s1595_s25, %s1597_s27, %s1853_s28, %s1853_s28, %s1856_s14  }
  0x2b   : > { %s1633_s21 = scalar_lea.hbm %s1846_s3, %s1096_s20  ;;  %s335_s17 = scalar_lea.vmem [#allocation7], %s1580_s19 }
  0x2c   : > { %s342_s22 = sshll.u32 %s335_s17, 4  ;;  %s1637_s24 = sadd.s32 4294967295, %s1479_s12   ;;  %s1655_s22 = int_to_ptr.vmem [resolvable:$true] %s342_s22 }
  0x2d   : > { %p87_p9 = scmp.ne.s32.totalorder %s1471_s10, %s1467_s30  ;;  %p1855_p12 = scmp.eq.s32.totalorder %s1637_s24, 0 }
  0x2e   : > { %p1040_p13 = scmp.ge.s32.totalorder %s1479_s12, 1  ;;  %p265_p0 = scmp.lt.s32.totalorder %s1479_s12, 3 }
  0x2f   : > { %p1647_p2 = por %p1855_p12, %p87_p9  ;;  %s1484_s23 = smov [#allocation3]  }
  0x30   : > { %p1651_p3 = pnand %p1040_p13, %p265_p0  ;;  %s280_s30 = sshll.u32 %s1484_s23, 4  ;;  %s1659_s30 = int_to_ptr.vmem [resolvable:$true] %s280_s30 }
  0x31   : > { %s1863_s20 = scalar_select %p1647_p2, 1, 0 }
  0x32   : > { %s1864_s19 = scalar_select %p1651_p3, 1, 0 }
  0x33   : > { %p1226_p4 = pneg %p1651_p3  ;;  %s1485_s12 = smov [#allocation8]  }
  0x34   : > { %s293_s25 = sshll.u32 %s1485_s12, 4  ;;  %s1351_s15 = scalar_lea.hbm %s1633_s21, 1024  ;;  %s1667_s25 = int_to_ptr.vmem [resolvable:$true] %s293_s25 }
  0x35   : > { %p1663_p6 = pnand %p1226_p4, %p1855_p12  ;;  %p1352_p8 = scmp.ne.s32.totalorder %s1633_s21, %s1351_s15 }
  0x36   : > { %s1356_s23 = scalar_lea.hbm %s1846_s3, 2048  ;;  %p1357_p9 = scmp.lt.u32.totalorder %s1633_s21, %s1846_s3 }
  0x37   : > { %p1354_p10 = pnand %p1352_p8, %p1323_p7  ;;  %p1358_p13 = scmp.lt.u32.totalorder %s1356_s23, %s1351_s15 }
  0x38   : > { %p1360_p4 = scmp.lt.u32.totalorder %s1351_s15, %s1633_s21 }
  0x39   : > { %p1355_p11 = pneg %p1354_p10  ;;  %p1359_p0 = por %p1358_p13, %p1357_p9 }
  0x3b   : > { %p1361_p1 = por %p1360_p4, %p1359_p0 }
  0x3d   : > { %p1362_p12 = pnand %p1361_p1, %p1355_p11 }
  0x3f   : > { %1365 = shalt.err (!%p1362_p12)
}
  0x40   : > { %s1366_s14 = scalar_lea.vmem %s1655_s22, 1024  ;;  %s1486_s18 = smov [#allocation7]  }
  0x41   : > { %p1367_p8 = scmp.ne.s32.totalorder %s1655_s22, %s1366_s14  ;;  %s1371_s17 = sshll.u32 %s1486_s18, 4  ;;  %s1372_s17 = int_to_ptr.vmem [resolvable:$false] %s1371_s17 }
  0x42   : > { %s1373_s28 = scalar_lea.vmem %s1372_s17, 2048  ;;  %p1374_p3 = scmp.lt.s32.totalorder %s1655_s22, %s1372_s17 }
  0x43   : > { %p1369_p10 = pnand %p1367_p8, %p1323_p7  ;;  %p1375_p9 = scmp.lt.s32.totalorder %s1373_s28, %s1366_s14 }
  0x45   : > { %p1370_p2 = pneg %p1369_p10  ;;  %p1376_p13 = por %p1375_p9, %p1374_p3 }
  0x47   : > { %p1377_p0 = pnand %p1376_p13, %p1370_p2 }
  0x49   : > { %1380 = shalt.err (!%p1377_p0)
}
  0x4a   : > { %s1866_s15 = smov 4   ;;  %s1867_s23 = smov 64  }
  0x4b   : > { %1239 = dma.hbm_to_vmem [thread:$0]  (!%p1591_p5), %s1633_s21, 1024, %s1655_s22, %s1597_s27, %s1867_s23, %s1867_s23, %s1866_s15  }
  0x4c   : > { %s1381_s2 = scalar_lea.hbm %s1844_s1, 1024  ;;  %p1383_p12 = pneg %p1663_p6 }
  0x4d   : > { %p1382_p7 = scmp.ne.s32.totalorder %s1844_s1, %s1381_s2  ;;  %p1388_p3 = scmp.lt.u32.totalorder %s1381_s2, %s1844_s1 }
  0x4f   : > { %p1384_p1 = pnand %p1383_p12, %p1382_p7 }
  0x51   : > { %p1385_p2 = pneg %p1384_p1 }
  0x53   : > { %p1390_p11 = pnand %p1388_p3, %p1385_p2 }
  0x55   : > { %1393 = shalt.err (!%p1390_p11)
}
  0x56   : > { %s1394_s27 = scalar_lea.vmem %s1659_s30, 1024  ;;  %p1402_p10 = scmp.lt.s32.totalorder %s1659_s30, %s1659_s30 }
  0x57   : > { %p1395_p5 = scmp.ne.s32.totalorder %s1659_s30, %s1394_s27  ;;  %p1403_p9 = scmp.lt.s32.totalorder %s1394_s27, %s1394_s27 }
  0x59   : > { %p1397_p4 = pnand %p1395_p5, %p1383_p12  ;;  %p1404_p13 = por %p1403_p9, %p1402_p10 }
  0x5b   : > { %p1398_p8 = pneg %p1397_p4 }
  0x5d   : > { %p1405_p0 = pnand %p1404_p13, %p1398_p8 }
  0x5f   : > { %1408 = shalt.err (!%p1405_p0)
}
  0x60   : > { %1229 = dma.hbm_to_vmem [thread:$0]  (!%p1663_p6), %s1844_s1, 1024, %s1659_s30, [#allocation4], %s1867_s23, %s1867_s23, %s1866_s15  }
  0x61   : > { %s1409_s18 = scalar_lea.hbm %s1849_s6, 1024 }
  0x62   : > { %p1410_p7 = scmp.ne.s32.totalorder %s1849_s6, %s1409_s18  ;;  %p1416_p3 = scmp.lt.u32.totalorder %s1409_s18, %s1849_s6 }
  0x64   : > { %p1412_p1 = pnand %p1410_p7, %p1383_p12 }
  0x66   : > { %p1413_p2 = pneg %p1412_p1 }
  0x68   : > { %p1418_p11 = pnand %p1416_p3, %p1413_p2 }
  0x6a   : > { %1421 = shalt.err (!%p1418_p11)
}
  0x6b   : > { %s1422_s30 = scalar_lea.vmem %s1667_s25, 1024  ;;  %p1430_p10 = scmp.lt.s32.totalorder %s1667_s25, %s1667_s25 }
  0x6c   : > { %p1423_p5 = scmp.ne.s32.totalorder %s1667_s25, %s1422_s30  ;;  %p1431_p9 = scmp.lt.s32.totalorder %s1422_s30, %s1422_s30 }
  0x6e   : > { %p1425_p4 = pnand %p1423_p5, %p1383_p12  ;;  %p1432_p13 = por %p1431_p9, %p1430_p10 }
  0x70   : > { %p1426_p8 = pneg %p1425_p4 }
  0x72   : > { %p1433_p0 = pnand %p1432_p13, %p1426_p8 }
  0x74   : > { %1436 = shalt.err (!%p1433_p0)
}
  0x75   : > { %1232 = dma.hbm_to_vmem [thread:$0]  (!%p1663_p6), %s1849_s6, 1024, %s1667_s25, [#allocation9], %s1867_s23, %s1867_s23, %s1866_s15  }
  0x76   : > { %p1868_p7 = scmp.ne.s32.totalorder %s1864_s19, 0 }
  0x77   : > { %p1869_p12 = scmp.eq.s32.totalorder (!%p1868_p7), %s1637_s24, 0 }
  0x78   : > { %367 = sbr.rel (%p1868_p7) target bundleno = 1103 (0x44f), region = 52 }
  0x7f   : > { %1454 = dma.done.wait (%p1869_p12), [#allocation4], 1024   ;;  %p1870_p1 = pmov %p1869_p12 }
  0x80   : > { %s373_s29 = sand.u32 1, %s1637_s24   ;;  %s375_s21 = sand.u32 1, %s1471_s10  }
  0x81   : > { %1456 = vsyncadd (%p1870_p1), [#allocation4], 4294966272  ;;  %s1052_s22 = sshll.u32 %s375_s21, 6  ;;  %s374_s12 = scalar_lea.sflag [#allocation6], %s373_s29 }
  0x82   : > { %s1762_s18 = scalar_lea.vmem [#allocation5], %s1052_s22  ;;  %p1871_p2 = scmp.ne.s32.totalorder %s1863_s20, 0 }
  0x84   : > { %1458 = dma.done.wait (%p1871_p2), %s374_s12, 2048  }
  0x85   : > { %1460 = vsyncadd (%p1871_p2), %s374_s12, 4294965248  ;;  %s1768_s19 = scalar_lea.vmem [#allocation7], %s1052_s22  ;;  %p1872_p6 = pmov %p1870_p1 }
  0x86   : > { %p1873_p3 = pmov %p1870_p1 }
  0x87   : > { %1462 = dma.done.wait (%p1872_p6), [#allocation9], 1024  }
  0x88   : > { %1464 = vsyncadd (%p1873_p3), [#allocation9], 4294966272  ;;  %p436_p11 = scmp.lt.s32.totalorder %s1637_s24, 1  ;;  %p1874_p5 = scmp.ne.s32.totalorder %s1637_s24, 0 }
  0x89   : > { %v1289_v0 = vld [vmem:[#allocation3] sm:$0xff] (!%p1874_p5)   ;;  %v1487_v1 = vmov (!%p1874_p5), 0.0   ;;  %v1290_v2 = vld [vmem:[#allocation3 + $0x8] sm:$0xff] (!%p1874_p5)   ;;  %vm1488_vm0 = vmmov (!%p1874_p5), 0   ;;  %v1291_v3 = vld [vmem:[#allocation3 + $0x10] sm:$0xff] (!%p1874_p5)  }
  0x8a   : > { %s1776_s25 = scalar_select %p436_p11, %s1637_s24, 1 }
  0x8b   : > { %451 = sbr.rel (%p1874_p5) target bundleno = 386 (0x182), region = 72  ;;  %1134 = vmatprep.subr.bf16.mxu0 (!%p1874_p5), %v1487_v1  ;;  %1150 = vmatprep.mubr.msk.bf16.mxu0 (!%p1874_p5), %vm1488_vm0, %v1487_v1  ;;  %v1292_v4 = vld [vmem:[#allocation3 + $0x18] sm:$0xff] (!%p1874_p5)   ;;  %v1293_v5 = vld [vmem:[#allocation3 + $0x20] sm:$0xff] (!%p1874_p5)   ;;  %v1294_v6 = vld [vmem:[#allocation3 + $0x28] sm:$0xff] (!%p1874_p5)  }
  0x8c   : > { %s438_s20 = scalar_lea.vmem %s1847_s4, %s1776_s25  ;;  %s1055_s17 = sshll.u32 %s1776_s25, 3  ;;  %1135 = vmatpush3.bf16.msra.mxu0 (!%p1874_p5), %v1289_v0  ;;  %v1295_v7 = vld [vmem:[#allocation3 + $0x30] sm:$0xff] (!%p1874_p5)   ;;  %v1296_v8 = vld [vmem:[#allocation3 + $0x38] sm:$0xff] (!%p1874_p5)  }
  0x8d   : > { %s1786_s28 = scalar_lea.vmem %s1848_s5, %s1055_s17  ;;  %s1791_s2 = scalar_lea.vmem %s1852_s9, %s1055_s17  ;;  %1136 = vmatprep.subr.bf16.mxu0 (!%p1874_p5), %v1487_v1  ;;  %v452_v9 = vld [vmem:[%s1843_s0] sm:$0xf] (!%p1874_p5) }
  0x90   : > { %1137 = vmatpush3.bf16.msra.mxu0 (!%p1874_p5), %v1290_v2 }
  0x91   : > { %1138 = vmatprep.subr.bf16.mxu0 (!%p1874_p5), %v1487_v1 }
  0x94   : > { %1139 = vmatpush3.bf16.msra.mxu0 %v1291_v3 }
  0x95   : > { %1140 = vmatprep.subr.bf16.mxu0 %v1487_v1 }
  0x98   : > { %1141 = vmatpush3.bf16.msra.mxu0 %v1292_v4 }
  0x99   : > { %1142 = vmatprep.subr.bf16.mxu0 %v1487_v1 }
  0x9c   : > { %1143 = vmatpush3.bf16.msra.mxu0 %v1293_v5 }
  0x9d   : > { %1144 = vmatprep.subr.bf16.mxu0 %v1487_v1 }
  0xa0   : > { %1145 = vmatpush3.bf16.msra.mxu0 %v1294_v6 }
  0xa1   : > { %1146 = vmatprep.subr.bf16.mxu0 %v1487_v1 }
  0xa4   : > { %1147 = vmatpush3.bf16.msra.mxu0 %v1295_v7 }
  0xa5   : > { %1148 = vmatprep.subr.bf16.mxu0 %v1487_v1 }
  0xa8   : > { %1149 = vmatpush3.bf16.msra.mxu0 %v1296_v8 }
  0xab   : > { %1151 = vmatmul.mubr.bf16.vlgmr.msra.gmra.mrb[0].mxu0 %v452_v9 }
 0x17e   : > { %v551_v10 = vpop.f32.mrb[0].mxu0 }
 0x17f   : > { %557 = vst [vmem:[#allocation2] sm:$0xff] %v551_v10  ;;  %v1152_v11 = vpop.f32.mrb[1].mxu0 }
 0x180   : > { %v554_v12 = vpop.f32.mrb[2].mxu0 }
 0x181   : > { %v1153_v13 = vpop.f32.mrb[3].mxu0 }
 0x182 PF: > { %p1875_p4 = scmp.eq.s32.totalorder %s1637_s24, 0 }
 0x183   : > { %v1297_v14 = vld [vmem:[%s1762_s18] sm:$0xff] (!%p1875_p4)   ;;  %v1489_v15 = vmov (!%p1875_p4), 0.0   ;;  %v1298_v16 = vld [vmem:[%s1762_s18 + $0x8] sm:$0xff] (!%p1875_p4)   ;;  %vm1490_vm1 = vmmov (!%p1875_p4), 0   ;;  %v1299_v17 = vld [vmem:[%s1762_s18 + $0x10] sm:$0xff] (!%p1875_p4)  }
 0x184   : > { %561 = sbr.rel (%p1875_p4) target bundleno = 635 (0x27b), region = 76  ;;  %1154 = vmatprep.subr.bf16.mxu0 (!%p1875_p4), %v1489_v15  ;;  %1170 = vmatprep.mubr.msk.bf16.mxu0 (!%p1875_p4), %vm1490_vm1, %v1489_v15  ;;  %v1300_v18 = vld [vmem:[%s1762_s18 + $0x18] sm:$0xff] (!%p1875_p4)   ;;  %v1301_v19 = vld [vmem:[%s1762_s18 + $0x20] sm:$0xff] (!%p1875_p4)   ;;  %v1302_v20 = vld [vmem:[%s1762_s18 + $0x28] sm:$0xff] (!%p1875_p4)  }
 0x185   : > { %1155 = vmatpush3.bf16.msra.mxu0 (!%p1875_p4), %v1297_v14  ;;  %v1303_v21 = vld [vmem:[%s1762_s18 + $0x30] sm:$0xff] (!%p1875_p4)   ;;  %v1304_v22 = vld [vmem:[%s1762_s18 + $0x38] sm:$0xff] (!%p1875_p4)  }
 0x186   : > { %1156 = vmatprep.subr.bf16.mxu0 (!%p1875_p4), %v1489_v15  ;;  %v562_v23 = vld [vmem:[#allocation2] sm:$0xff] (!%p1875_p4) }
 0x187   : > { %v563_v24 = vpack.c.bf16 (!%p1875_p4), %v562_v23, %v562_v23 }
 0x189   : > { %1157 = vmatpush3.bf16.msra.mxu0 (!%p1875_p4), %v1298_v16 }
 0x18a   : > { %1158 = vmatprep.subr.bf16.mxu0 (!%p1875_p4), %v1489_v15 }
 0x18d   : > { %1159 = vmatpush3.bf16.msra.mxu0 %v1299_v17 }
 0x18e   : > { %1160 = vmatprep.subr.bf16.mxu0 %v1489_v15 }
 0x191   : > { %1161 = vmatpush3.bf16.msra.mxu0 %v1300_v18 }
 0x192   : > { %1162 = vmatprep.subr.bf16.mxu0 %v1489_v15 }
 0x195   : > { %1163 = vmatpush3.bf16.msra.mxu0 %v1301_v19 }
 0x196   : > { %1164 = vmatprep.subr.bf16.mxu0 %v1489_v15 }
 0x199   : > { %1165 = vmatpush3.bf16.msra.mxu0 %v1302_v20 }
 0x19a   : > { %1166 = vmatprep.subr.bf16.mxu0 %v1489_v15 }
 0x19d   : > { %1167 = vmatpush3.bf16.msra.mxu0 %v1303_v21 }
 0x19e   : > { %1168 = vmatprep.subr.bf16.mxu0 %v1489_v15 }
 0x1a1   : > { %1169 = vmatpush3.bf16.msra.mxu0 %v1304_v22 }
 0x1a4   : > { %1171 = vmatmul.mubr.bf16.vlgmr.msra.gmra.mrb[0].mxu0 %v563_v24 }
 0x277   : > { %v662_v25 = vpop.f32.mrb[0].mxu0 }
 0x278   : > { %668 = vst [vmem:[#allocation2] sm:$0xff] %v662_v25  ;;  %v1172_v26 = vpop.f32.mrb[1].mxu0 }
 0x279   : > { %v665_v27 = vpop.f32.mrb[2].mxu0 }
 0x27a   : > { %v1173_v28 = vpop.f32.mrb[3].mxu0 }
 0x27b PF: > { %v1305_v29 = vld [vmem:[%s1768_s19] sm:$0xff]   ;;  %v1491_v30 = vmov 0.0   ;;  %v1306_v31 = vld [vmem:[%s1768_s19 + $0x8] sm:$0xff]   ;;  %vm1492_vm2 = vmmov 0   ;;  %v1307_v32 = vld [vmem:[%s1768_s19 + $0x10] sm:$0xff]   ;;  %p1084_p8 = scmp.ne.s32.totalorder %s1637_s24, 1 }
 0x27c   : > { %1174 = vmatprep.subr.bf16.mxu0 %v1491_v30  ;;  %1190 = vmatprep.mubr.msk.bf16.mxu0 %vm1492_vm2, %v1491_v30  ;;  %v1308_v33 = vld [vmem:[%s1768_s19 + $0x18] sm:$0xff]   ;;  %v1309_v34 = vld [vmem:[%s1768_s19 + $0x20] sm:$0xff]   ;;  %v1310_v35 = vld [vmem:[%s1768_s19 + $0x28] sm:$0xff]   ;;  %v1493_v50 = vmov (!%p1084_p8), 0.0   ;;  %vm1494_vm3 = vmmov (!%p1084_p8), 0  }
 0x27d   : > { %1175 = vmatpush3.bf16.msra.mxu0 %v1305_v29  ;;  %v1311_v36 = vld [vmem:[%s1768_s19 + $0x30] sm:$0xff]   ;;  %v1312_v37 = vld [vmem:[%s1768_s19 + $0x38] sm:$0xff]   ;;  %v1313_v49 = vld [vmem:[#allocation8] sm:$0xff] (!%p1084_p8)  }
 0x27e   : > { %1176 = vmatprep.subr.bf16.mxu0 %v1491_v30  ;;  %v670_v38 = vld [vmem:[%s1786_s28] sm:$0xff]  ;;  %v1314_v51 = vld [vmem:[#allocation8 + $0x8] sm:$0xff] (!%p1084_p8)   ;;  %v1315_v52 = vld [vmem:[#allocation8 + $0x10] sm:$0xff] (!%p1084_p8)  }
 0x27f   : > { %v671_v39 = vpack.c.bf16 %v670_v38, %v670_v38  ;;  %v669_v40 = vld [vmem:[#allocation2] sm:$0xff]  ;;  %v1317_v54 = vld [vmem:[#allocation8 + $0x20] sm:$0xff] (!%p1084_p8)   ;;  %v1318_v55 = vld [vmem:[#allocation8 + $0x28] sm:$0xff] (!%p1084_p8)  }
 0x280   : > { %v1083_v42 = vld [vmem:[%s438_s20] ss:$0 sm:$0xff]  ;;  %v1319_v56 = vld [vmem:[#allocation8 + $0x30] sm:$0xff] (!%p1084_p8)  }
 0x281   : > { %1177 = vmatpush3.bf16.msra.mxu0 %v1306_v31  ;;  %v1316_v53 = vld [vmem:[#allocation8 + $0x18] sm:$0xff] (!%p1084_p8)  }
 0x282   : > { %1178 = vmatprep.subr.bf16.mxu0 %v1491_v30  ;;  %v1320_v57 = vld [vmem:[#allocation8 + $0x38] sm:$0xff] (!%p1084_p8)  }
 0x283   : > { %v1085_v59 = vld [vmem:[%s1850_s7] ss:$0 sm:$0xff] (!%p1084_p8) }
 0x285   : > { %1179 = vmatpush3.bf16.msra.mxu0 %v1307_v32 }
 0x286   : > { %1180 = vmatprep.subr.bf16.mxu0 %v1491_v30 }
 0x289   : > { %1181 = vmatpush3.bf16.msra.mxu0 %v1308_v33 }
 0x28a   : > { %1182 = vmatprep.subr.bf16.mxu0 %v1491_v30 }
 0x28d   : > { %1183 = vmatpush3.bf16.msra.mxu0 %v1309_v34 }
 0x28e   : > { %1184 = vmatprep.subr.bf16.mxu0 %v1491_v30 }
 0x291   : > { %1185 = vmatpush3.bf16.msra.mxu0 %v1310_v35 }
 0x292   : > { %1186 = vmatprep.subr.bf16.mxu0 %v1491_v30 }
 0x295   : > { %1187 = vmatpush3.bf16.msra.mxu0 %v1311_v36 }
 0x296   : > { %1188 = vmatprep.subr.bf16.mxu0 %v1491_v30 }
 0x299   : > { %1189 = vmatpush3.bf16.msra.mxu0 %v1312_v37 }
 0x29a   : > { %1194 = vmatprep.subr.bf16.mxu0 (!%p1084_p8), %v1493_v50 }
 0x29c   : > { %1191 = vmatmul.mubr.bf16.vlgmr.msra.gmra.mrb[0].mxu0 %v671_v39 }
 0x29d   : > { %1195 = vmatpush3.bf16.msra.mxu0 (!%p1084_p8), %v1313_v49  ;;  %1210 = vmatprep.mubr.msk.bf16.mxu0 (!%p1084_p8), %vm1494_vm3, %v1493_v50 }
 0x29e   : > { %1196 = vmatprep.subr.bf16.mxu0 (!%p1084_p8), %v1493_v50 }
 0x2a1   : > { %1197 = vmatpush3.bf16.msra.mxu0 (!%p1084_p8), %v1314_v51 }
 0x2a2   : > { %1198 = vmatprep.subr.bf16.mxu0 (!%p1084_p8), %v1493_v50 }
 0x2a5   : > { %1199 = vmatpush3.bf16.msra.mxu0 (!%p1084_p8), %v1315_v52 }
 0x2a6   : > { %1200 = vmatprep.subr.bf16.mxu0 (!%p1084_p8), %v1493_v50 }
 0x2a9   : > { %1201 = vmatpush3.bf16.msra.mxu0 (!%p1084_p8), %v1316_v53 }
 0x2aa   : > { %1202 = vmatprep.subr.bf16.mxu0 (!%p1084_p8), %v1493_v50 }
 0x2ad   : > { %1203 = vmatpush3.bf16.msra.mxu0 (!%p1084_p8), %v1317_v54 }
 0x2ae   : > { %1204 = vmatprep.subr.bf16.mxu0 (!%p1084_p8), %v1493_v50 }
 0x2b1   : > { %1205 = vmatpush3.bf16.msra.mxu0 (!%p1084_p8), %v1318_v55 }
 0x2b2   : > { %1206 = vmatprep.subr.bf16.mxu0 (!%p1084_p8), %v1493_v50 }
 0x2b5   : > { %1207 = vmatpush3.bf16.msra.mxu0 (!%p1084_p8), %v1319_v56 }
 0x2b6   : > { %1208 = vmatprep.subr.bf16.mxu0 (!%p1084_p8), %v1493_v50 }
 0x2b9   : > { %1209 = vmatpush3.bf16.msra.mxu0 (!%p1084_p8), %v1320_v57 }
 0x36f   : > { %v770_v41 = vpop.f32.mrb[0].mxu0 }
 0x370   : > { %v776_v43 = vadd.f32 %v770_v41, %v669_v40  ;;  %v1192_v44 = vpop.f32.mrb[1].mxu0  ;;  %791 = sbr.rel (%p1084_p8) target bundleno = 1103 (0x44f), region = 80 }
 0x371   : > { %v773_v45 = vpop.f32.mrb[2].mxu0 }
 0x372   : > { %v784_v46 = vadd.f32 %v1083_v42, %v776_v43  ;;  %v1193_v47 = vpop.f32.mrb[3].mxu0 }
 0x374   : > { %v785_v48 = vmax.f32 %v784_v46, 0.0 }
 0x376   : > { %786 = vst [vmem:[%s1791_s2] sm:$0xff] %v785_v48  ;;  %787 = vst [vmem:[#allocation2] sm:$0xff] %v785_v48  ;;  %v792_v58 = vpack.c.bf16 (!%p1084_p8), %v785_v48, %v785_v48 }
 0x378   : > { %1211 = vmatmul.mubr.bf16.vlgmr.msra.gmra.mrb[0].mxu0 %v792_v58 }
 0x44b   : > { %v898_v60 = vpop.f32.mrb[0].mxu0 }
 0x44c   : > { %v899_v61 = vadd.f32 %v1085_v59, %v898_v60  ;;  %v1212_v62 = vpop.f32.mrb[1].mxu0 }
 0x44d   : > { %v901_v63 = vpop.f32.mrb[2].mxu0 }
 0x44e   : > { %904 = vst [vmem:[%s1851_s8] sm:$0xff] %v899_v61  ;;  %v1213_v0 = vpop.f32.mrb[3].mxu0 }
 0x44f PF: > { %p22_p10 = scmp.ge.s32.totalorder %s1566_s13, 4   ;;  %s1876_s30 = smov %s1471_s10 }
 0x450   : > { %s1877_s10 = smov %s1475_s11  ;;  %s1878_s11 = smov %s1575_s16 }
 0x451   : > { %s1879_s12 = smov %s1566_s13  ;;  %24 = sbr.rel (!%p22_p10) target bundleno = 7 (0x7), region = 138 }
 0x458   :  { %930 = vsyncpa [#allocation4], 1 }
 0x459   :  { %932 = vsyncpa [#allocation4 + $0x1], 1 }
 0x45a   :  { %933 = vsyncpa [#allocation6], 1 }
 0x45b   :  { %935 = vsyncpa [#allocation6 + $0x1], 1 }
 0x45c   :  { %936 = vsyncpa [#allocation9], 1 }

</bundles_post_ra>
